<compile_context>
chip_gen: v6e
topology: v6e:2x2x1
jax: 0.10.0
libtpu: 0.0.40
codegen_flags: <defaults>
</compile_context>

<pallas_src>
import math

import jax
import jax.numpy as jnp
from jax import lax
from jax.experimental import pallas as pl
from jax.experimental.pallas import tpu as pltpu


def fnn_kernel(x_ref, w1_ref, b1_ref, w2_ref, b2_ref, o_ref):
    # fc1 (transposed): hT = w1 @ x^T -> (H, TM).
    # w1 keeps its PyTorch (H, D) layout and contracts over its last dim
    # (natural MXU LHS); only the streamed x tile is reoriented per step.
    h_t = lax.dot_general(
        w1_ref[...], x_ref[...],
        dimension_numbers=(((1,), (1,)), ((), ())),
        preferred_element_type=jnp.float32,
    )
    h_t = jnp.maximum(h_t + b1_ref[...], 0.0)          # (H, TM) + (H, 1), f32 VPU
    # fc2 (transposed): out^T = w2 @ hT -> (O, TM); both operands in natural
    # MXU orientation, output tile is lane-dense (last dim = TM).
    out_t = lax.dot_general(
        w2_ref[...], h_t,
        dimension_numbers=(((1,), (0,)), ((), ())),
        preferred_element_type=jnp.float32,
    )
    o_ref[...] = (out_t + b2_ref[...]).astype(o_ref.dtype)


def _round_up(n, m):
    return ((n + m - 1) // m) * m


_VMEM_CAP_BYTES = None


def _vmem_capacity_bytes():
    """Physical VMEM of the current TPU generation (64 MiB fallback)."""
    global _VMEM_CAP_BYTES
    if _VMEM_CAP_BYTES is None:
        cap = None
        try:
            cap = int(getattr(pltpu.get_tpu_info(), "vmem_capacity_bytes"))
        except Exception:
            cap = None
        _VMEM_CAP_BYTES = cap if cap else 64 * 1024 * 1024
    return _VMEM_CAP_BYTES


def _max_tile_rows(D, H, O, budget_bytes):
    """Largest batch-tile (multiple of 128) whose footprint fits the budget."""
    tm = 128
    for cand in (256, 512, 1024, 2048):
        words = (
            2 * cand * D                      # x tiles (double-buffered)
            + 2 * O * cand                    # out^T tiles (double-buffered)
            + 2 * (H * D + O * H + H + O)     # weights/biases (Pallas 2x buffers)
            + (H + O) * cand                  # f32 intermediates in-kernel
        )
        if 4 * words <= budget_bytes:
            tm = cand
    return tm


@jax.jit
def fnn_forward(x, w1, b1, w2, b2):
    """x: (B, D); w1: (H, D); b1: (H,); w2: (O, H); b2: (O,) — PyTorch shapes."""
    B, D = x.shape
    H = w1.shape[0]
    O = w2.shape[0]

    # Generation-aware VMEM request; tile footprint targets half of it so the
    # compiler keeps headroom for internal scratch.
    vmem_limit = int(0.8 * _vmem_capacity_bytes())
    tm_max = _max_tile_rows(D, H, O, vmem_limit // 2)

    if B <= 128:
        TM = B                                 # single full-extent block (always legal)
    else:
        # >= 2 grid steps (dual-TC on v7x), 128-multiple tiles for lane-dense
        # output stores, capped by the VMEM-derived maximum.
        TM = max(128, min(tm_max, _round_up(pl.cdiv(B, 2), 128)))
    grid = (pl.cdiv(B, TM),)

    # Column-vector biases for the transposed (lane-dense) layout.
    b1_2d = b1.reshape(H, 1)
    b2_2d = b2.reshape(O, 1)

    out_t = pl.pallas_call(
        fnn_kernel,
        out_shape=jax.ShapeDtypeStruct((O, B), x.dtype),
        grid=grid,
        in_specs=[
            pl.BlockSpec((TM, D), lambda i: (i, 0)),   # x: streamed per batch tile
            pl.BlockSpec((H, D), lambda i: (0, 0)),    # w1: resident (PyTorch layout)
            pl.BlockSpec((H, 1), lambda i: (0, 0)),    # b1: resident
            pl.BlockSpec((O, H), lambda i: (0, 0)),    # w2: resident (PyTorch layout)
            pl.BlockSpec((O, 1), lambda i: (0, 0)),    # b2: resident
        ],
        out_specs=pl.BlockSpec((O, TM), lambda i: (0, i)),   # lane-dense out^T tiles
        compiler_params=pltpu.CompilerParams(
            dimension_semantics=("parallel",),          # dual-TC on v7x
            vmem_limit_bytes=vmem_limit,
        ),
    )(x, w1, b1_2d, w2, b2_2d)

    return out_t.T                                      # (B, O); tiny, fused under jit


def init_linear_params(key, in_features, out_features, dtype=jnp.float32):
    """Deterministic init mimicking torch.nn.Linear default (U(+/- 1/sqrt(fan_in)))."""
    k_w, k_b = jax.random.split(key)
    bound = 1.0 / math.sqrt(in_features)
    w = jax.random.uniform(k_w, (out_features, in_features), dtype, -bound, bound)
    b = jax.random.uniform(k_b, (out_features,), dtype, -bound, bound)
    return w, b


if __name__ == "__main__":
    # Shapes consistent with FNNApproximator(input_dim, hidden_dim, output_dim).
    # batch=200 exercises the multi-step grid (TM=128 -> 2 steps) and the
    # unpadded / masked-edge-block path (rows 128..199 in the last tile).
    batch, input_dim, hidden_dim, output_dim = 200, 16, 32, 4

    key = jax.random.PRNGKey(0)
    k_x, k_fc1, k_fc2 = jax.random.split(key, 3)

    x = jax.random.normal(k_x, (batch, input_dim), dtype=jnp.float32)
    w1, b1 = init_linear_params(k_fc1, input_dim, hidden_dim)
    w2, b2 = init_linear_params(k_fc2, hidden_dim, output_dim)

    out = fnn_forward(x, w1, b1, w2, b2)
    out = jax.block_until_ready(out)

    # Reference check in plain JAX (same math as the PyTorch forward).
    ref = jnp.maximum(x @ w1.T + b1, 0.0) @ w2.T + b2
    assert out.shape == (batch, output_dim)
    assert jnp.allclose(out, ref, atol=1e-5, rtol=1e-5)

    print("KERNEL_OK")
</pallas_src>

<mosaic_0001>
module attributes {stable_mosaic.version = 11 : i64} {
  func.func @fnn_kernel(%arg0: i32, %arg1: memref<128x16xf32, #tpu.memory_space<vmem>>, %arg2: memref<32x16xf32, #tpu.memory_space<vmem>>, %arg3: memref<32x1xf32, #tpu.memory_space<vmem>>, %arg4: memref<4x32xf32, #tpu.memory_space<vmem>>, %arg5: memref<4x1xf32, #tpu.memory_space<vmem>>, %arg6: memref<4x128xf32, #tpu.memory_space<vmem>>) attributes {dimension_semantics = [#tpu.dimension_semantics<parallel>], iteration_bounds = array<i64: 2>, scalar_prefetch = 0 : i64, scratch_operands = 0 : i64, tpu.core_type = #tpu.core_type<tc>, window_params = [{transform_indices = @transform_0, window_bounds = array<i64: 128, 16>}, {pipeline_mode = #tpu.pipeline_mode<synchronous>, transform_indices = @transform_1, window_bounds = array<i64: 32, 16>}, {pipeline_mode = #tpu.pipeline_mode<synchronous>, transform_indices = @transform_2, window_bounds = array<i64: 32, 1>}, {pipeline_mode = #tpu.pipeline_mode<synchronous>, transform_indices = @transform_3, window_bounds = array<i64: 4, 32>}, {pipeline_mode = #tpu.pipeline_mode<synchronous>, transform_indices = @transform_4, window_bounds = array<i64: 4, 1>}, {transform_indices = @transform_5, window_bounds = array<i64: 4, 128>}]} {
    %c0 = arith.constant 0 : index
    %c0_0 = arith.constant 0 : index
    %0 = vector.load %arg2[%c0, %c0_0] : memref<32x16xf32, #tpu.memory_space<vmem>>, vector<32x16xf32>
    %c0_1 = arith.constant 0 : index
    %c0_2 = arith.constant 0 : index
    %1 = vector.load %arg1[%c0_1, %c0_2] : memref<128x16xf32, #tpu.memory_space<vmem>>, vector<128x16xf32>
    %cst = arith.constant dense<0.000000e+00> : vector<32x128xf32>
    %2 = tpu.matmul %0, %1, %cst {dimension_numbers = #tpu.dot_dimension_numbers<[1], [1], [0], [0], [0, 0, 1, 0], [], []>} : vector<32x16xf32>, vector<128x16xf32>, vector<32x128xf32> -> vector<32x128xf32>
    %c0_3 = arith.constant 0 : index
    %c0_4 = arith.constant 0 : index
    %3 = vector.load %arg3[%c0_3, %c0_4] : memref<32x1xf32, #tpu.memory_space<vmem>>, vector<32x1xf32>
    %4 = vector.broadcast %3 : vector<32x1xf32> to vector<32x128xf32>
    %5 = arith.addf %2, %4 : vector<32x128xf32>
    %cst_5 = arith.constant 0.000000e+00 : f32
    %6 = vector.broadcast %cst_5 : f32 to vector<32x128xf32>
    %7 = arith.maximumf %5, %6 : vector<32x128xf32>
    %c0_6 = arith.constant 0 : index
    %c0_7 = arith.constant 0 : index
    %8 = vector.load %arg4[%c0_6, %c0_7] : memref<4x32xf32, #tpu.memory_space<vmem>>, vector<4x32xf32>
    %cst_8 = arith.constant dense<0.000000e+00> : vector<4x128xf32>
    %9 = tpu.matmul %8, %7, %cst_8 {dimension_numbers = #tpu.dot_dimension_numbers<[1], [0], [0], [1], [0, 0, 1, 1], [], []>} : vector<4x32xf32>, vector<32x128xf32>, vector<4x128xf32> -> vector<4x128xf32>
    %c0_9 = arith.constant 0 : index
    %c0_10 = arith.constant 0 : index
    %10 = vector.load %arg5[%c0_9, %c0_10] : memref<4x1xf32, #tpu.memory_space<vmem>>, vector<4x1xf32>
    %11 = vector.broadcast %10 : vector<4x1xf32> to vector<4x128xf32>
    %12 = arith.addf %9, %11 : vector<4x128xf32>
    %c0_11 = arith.constant 0 : index
    %c0_12 = arith.constant 0 : index
    %13 = vector.load %arg6[%c0_11, %c0_12] : memref<4x128xf32, #tpu.memory_space<vmem>>, vector<4x128xf32>
    tpu.vector_store %arg6[%c0_11, %c0_12], %12 {strides = array<i32>} : memref<4x128xf32, #tpu.memory_space<vmem>>, vector<4x128xf32>,
    return
  }
  func.func @transform_0(%arg0: i32) -> (i32, i32) {
    %c0_i32 = arith.constant 0 : i32
    %c0_i32_0 = arith.constant 0 : i32
    return %arg0, %c0_i32 : i32, i32
  }
  func.func @transform_1(%arg0: i32) -> (i32, i32) {
    %c0_i32 = arith.constant 0 : i32
    %c0_i32_0 = arith.constant 0 : i32
    %c0_i32_1 = arith.constant 0 : i32
    return %c0_i32, %c0_i32_0 : i32, i32
  }
  func.func @transform_2(%arg0: i32) -> (i32, i32) {
    %c0_i32 = arith.constant 0 : i32
    %c0_i32_0 = arith.constant 0 : i32
    %c0_i32_1 = arith.constant 0 : i32
    return %c0_i32, %c0_i32_0 : i32, i32
  }
  func.func @transform_3(%arg0: i32) -> (i32, i32) {
    %c0_i32 = arith.constant 0 : i32
    %c0_i32_0 = arith.constant 0 : i32
    %c0_i32_1 = arith.constant 0 : i32
    return %c0_i32, %c0_i32_0 : i32, i32
  }
  func.func @transform_4(%arg0: i32) -> (i32, i32) {
    %c0_i32 = arith.constant 0 : i32
    %c0_i32_0 = arith.constant 0 : i32
    %c0_i32_1 = arith.constant 0 : i32
    return %c0_i32, %c0_i32_0 : i32, i32
  }
  func.func @transform_5(%arg0: i32) -> (i32, i32) {
    %c0_i32 = arith.constant 0 : i32
    %c0_i32_0 = arith.constant 0 : i32
    return %c0_i32, %arg0 : i32, i32
  }
}

</mosaic_0001>

<bundles_post_ra>
// kernel: fnn_forward.1
= control target key start
LH: loop header
LB: loop body
LE: loop exit
PB: predicated region body
PF: predicated region fallthrough
CT: control target
= control target key end

     0   :  { %10 = vsyncpa [#allocation3], 0  ;;  %s1016_s0 = inlined_call_operand.vmem [shape: f32[200,16], index: 0, kind: input, shape index: {}]   ;;  %s1017_s1 = inlined_call_operand.vmem [shape: f32[32,16], index: 1, kind: input, shape index: {}]   ;;  %s1018_s2 = inlined_call_operand.vmem [shape: f32[32,1], index: 2, kind: input, shape index: {}]   ;;  %s1019_s3 = inlined_call_operand.vmem [shape: f32[4,32], index: 3, kind: input, shape index: {}]   ;;  %s1020_s4 = inlined_call_operand.vmem [shape: f32[4,1], index: 4, kind: input, shape index: {}]   ;;  %s1021_s5 = inlined_call_operand.hbm [shape: f32[4,200], index: 5, kind: output, shape index: {}]  }
   0x1   :  { %12 = vsyncpa [#allocation3 + $0x1], 0  ;;  %s840_s18 = smov 0   ;;  %s842_s19 = smov 0  }
   0x2   :  { %s844_s20 = smov 0   ;;  %s846_s21 = smov 0  }
   0x3 LB: > { %s861_s22 = sadd.s32 4294967295, %s804_s21   ;;  %s594_s23 = sadd.s32 4294967294, %s804_s21   ;;  %s804_s21 = sphi %s846_s21, %s1027_s21   ;;  %s800_s20 = sphi %s844_s20, %s1026_s20   ;;  %s796_s19 = sphi %s842_s19, %s1025_s19   ;;  %s792_s18 = sphi %s840_s18, %s1024_s18  }
   0x4   : > { %s865_s24 = sadd.s32 1, %s804_s21   ;;  %s135_s25 = sadd.s32 1, %s800_s20 }
   0x5   : > { %s132_s26 = ssub.s32 %s804_s21, %s865_s24  ;;  %p145_p0 = scmp.ne.s32.totalorder %s800_s20, %s796_s19 }
   0x6   : > { %p133_p1 = scmp.eq.s32.totalorder %s132_s26, 0  ;;  %p146_p2 = scmp.eq.s32.totalorder %s861_s22, 1 }
   0x7   : > { %p151_p3 = scmp.ne.s32.totalorder %s796_s19, %s792_s18  ;;  %p152_p4 = scmp.eq.s32.totalorder %s594_s23, 1 }
   0x8   : > { %s876_s27 = scalar_select %p133_p1, %s800_s20, %s135_s25  }
   0x9   : > { %p878_p5 = por %p146_p2, %p145_p0  ;;  %p882_p6 = por %p152_p4, %p151_p3 }
   0xa   : > { %p597_p7 = scmp.ge.s32.totalorder %s804_s21, 1  ;;  %p199_p8 = scmp.lt.s32.totalorder %s804_s21, 3 }
   0xc   : > { %p200_p9 = pnand %p597_p7, %p199_p8 }
   0xd   : > { %s599_s30 = sshll.u32 (!%p200_p9), %s861_s22, 4  ;;  %s228_s14 = sand.u32 (!%p200_p9), 1, %s796_s19  }
   0xe   : > { %203 = sbr.rel (%p200_p9) target bundleno = 503 (0x1f7), region = 40  ;;  %p236_p10 = scmp.lt.s32.totalorder (!%p200_p9), %s599_s30, 24 }
   0xf   : > { %s598_s15 = sshll.u32 (!%p200_p9), %s228_s14, 2 }
  0x10   : > { %s230_s17 = scalar_lea.vmem (!%p200_p9), [#allocation2], %s598_s15 }
  0x11   : > { %s535_s23 = sshll.u32 (!%p200_p9), %s230_s17, 4  ;;  %s536_s23 = int_to_ptr.vmem [resolvable:$true] %s535_s23 }
  0x12   : > { %s744_s7 = scalar_lea.vmem (!%p200_p9), %s536_s23, 64 }
  0x13   : > { %vm289_vm0 = vcmask 130048   ;;  %v245_v0 = vld [vmem:[%s1017_s1] sm:$0xff]  ;;  %v806_v1 = vmov 0   ;;  %v268_v2 = vld [vmem:[%s1018_s2 + $0x18] sm:$0xff]  ;;  %v266_v3 = vld [vmem:[%s1018_s2 + $0x8] sm:$0xff]  ;;  %s1029_s30 = smov (!%p236_p10, %s599_s30), 24  ;;  %p745_p11 = scmp.ne.s32.totalorder %s536_s23, %s744_s7 }
  0x14   : > { %683 = vmatprep.mubr.msk.f32.mxu0 %vm289_vm0, %v245_v0  ;;  %742 = vset.pattern.permute.xlu0 %v806_v1  ;;  %v267_v4 = vld [vmem:[%s1018_s2 + $0x10] sm:$0xff]  ;;  %v265_v5 = vld [vmem:[%s1018_s2] sm:$0xff]  ;;  %s600_s16 = sshll.u32 %s1029_s30, 3  ;;  %v246_v23 = vld [vmem:[%s1017_s1 + $0x8] sm:$0xff]  ;;  %v807_v26 = vmov 0.0   ;;  %vm808_vm1 = vmmov 0  }
  0x15   : > { %286 = vperm.xlu0 %742, %v268_v2   ;;  %743 = vset.pattern.permute.xlu1 %v806_v1  ;;  %s908_s25 = scalar_lea.vmem %s1016_s0, %s600_s16  ;;  %v440_v8 = vld [vmem:[%s1020_s4] sm:$0xf]  ;;  %v247_v24 = vld [vmem:[%s1017_s1 + $0x10] sm:$0xff]  ;;  %v248_v25 = vld [vmem:[%s1017_s1 + $0x18] sm:$0xff]  ;;  %vm446_vm2 = vcmask 261120   ;;  %s623_s16 = sshll.u32 %s861_s22, 6 }
  0x16   : > { %276 = vperm.xlu1 %743, %v266_v3   ;;  %v264_v6 = vld [vmem:[%s908_s25 + $0x78] sm:$0xff]  ;;  %v263_v7 = vld [vmem:[%s908_s25 + $0x70] sm:$0xff]  ;;  %v262_v9 = vld [vmem:[%s908_s25 + $0x68] sm:$0xff]  ;;  %689 = vmatprep.subr.mxu1 %v807_v26  ;;  %s981_s6 = scalar_lea.hbm %s1021_s5, %s623_s16  ;;  %s522_s30 = scalar_lea.sflag [#allocation3], %s228_s14 }
  0x17   : > { %651 = vmatprep.subr.msk.mxu0 %vm289_vm0, %v264_v6  ;;  %v261_v10 = vld [vmem:[%s908_s25 + $0x60] sm:$0xff]  ;;  %v260_v11 = vld [vmem:[%s908_s25 + $0x58] sm:$0xff]  ;;  %v259_v12 = vld [vmem:[%s908_s25 + $0x50] sm:$0xff]  ;;  %697 = vmatprep.mubr.msk.f32.mxu1 %vm808_vm1, %v807_v26  ;;  %p746_p12 = pnand %p745_p11, %p878_p5  ;;  %s809_s22 = smov [#allocation2]  }
  0x18   : > { %652 = vmatpush3.xpose.msk.msra.mxu0 %vm289_vm0, %v264_v6  ;;  %v258_v13 = vld [vmem:[%s908_s25 + $0x48] sm:$0xff]  ;;  %v257_v14 = vld [vmem:[%s908_s25 + $0x40] sm:$0xff]  ;;  %v256_v15 = vld [vmem:[%s908_s25 + $0x38] sm:$0xff]  ;;  %s748_s8 = sshll.u32 %s809_s22, 4  ;;  %s749_s8 = int_to_ptr.vmem [resolvable:$false] %s748_s8 }
  0x19   : > { %281 = vperm.xlu0 %742, %v267_v4   ;;  %653 = vmatprep.subr.msk.mxu0 %vm289_vm0, %v263_v7  ;;  %v255_v16 = vld [vmem:[%s908_s25 + $0x30] sm:$0xff]  ;;  %v254_v17 = vld [vmem:[%s908_s25 + $0x28] sm:$0xff]  ;;  %v253_v18 = vld [vmem:[%s908_s25 + $0x20] sm:$0xff]  ;;  %p747_p13 = pneg %p746_p12  ;;  %s750_s9 = scalar_lea.vmem %s749_s8, 128 }
  0x1a   : > { %271 = vperm.xlu1 %743, %v265_v5   ;;  %v252_v19 = vld [vmem:[%s908_s25 + $0x18] sm:$0xff]  ;;  %v251_v20 = vld [vmem:[%s908_s25 + $0x10] sm:$0xff]  ;;  %v250_v21 = vld [vmem:[%s908_s25 + $0x8] sm:$0xff]  ;;  %p751_p0 = scmp.lt.s32.totalorder %s536_s23, %s749_s8  ;;  %p752_p1 = scmp.lt.s32.totalorder %s750_s9, %s744_s7 }
  0x1b   : > { %v249_v22 = vld [vmem:[%s908_s25] sm:$0xff] }
  0x1c   : > { %654 = vmatpush3.xpose.msk.msra.mxu0 %vm289_vm0, %v263_v7  ;;  %v439_v43 = vld [vmem:[%s1019_s3] sm:$0xf]  ;;  %p753_p2 = por %p752_p1, %p751_p0 }
  0x1d   : > { %443 = vperm.xlu0 %742, %v440_v8   ;;  %655 = vmatprep.subr.msk.mxu0 %vm289_vm0, %v262_v9 }
  0x1e   : > { %p754_p3 = pnand %p753_p2, %p747_p13 }
  0x20   : > { %656 = vmatpush3.xpose.msk.msra.mxu0 %vm289_vm0, %v262_v9 }
  0x21   : > { %657 = vmatprep.subr.msk.mxu0 %vm289_vm0, %v261_v10 }
  0x24   : > { %658 = vmatpush3.xpose.msk.msra.mxu0 %vm289_vm0, %v261_v10 }
  0x25   : > { %659 = vmatprep.subr.msk.mxu0 %vm289_vm0, %v260_v11 }
  0x28   : > { %660 = vmatpush3.xpose.msk.msra.mxu0 %vm289_vm0, %v260_v11 }
  0x29   : > { %661 = vmatprep.subr.msk.mxu0 %vm289_vm0, %v259_v12 }
  0x2c   : > { %662 = vmatpush3.xpose.msk.msra.mxu0 %vm289_vm0, %v259_v12 }
  0x2d   : > { %663 = vmatprep.subr.msk.mxu0 %vm289_vm0, %v258_v13 }
  0x30   : > { %664 = vmatpush3.xpose.msk.msra.mxu0 %vm289_vm0, %v258_v13 }
  0x31   : > { %665 = vmatprep.subr.msk.mxu0 %vm289_vm0, %v257_v14 }
  0x34   : > { %666 = vmatpush3.xpose.msk.msra.mxu0 %vm289_vm0, %v257_v14 }
  0x35   : > { %667 = vmatprep.subr.msk.mxu0 %vm289_vm0, %v256_v15 }
  0x38   : > { %668 = vmatpush3.xpose.msk.msra.mxu0 %vm289_vm0, %v256_v15 }
  0x39   : > { %669 = vmatprep.subr.msk.mxu0 %vm289_vm0, %v255_v16 }
  0x3c   : > { %670 = vmatpush3.xpose.msk.msra.mxu0 %vm289_vm0, %v255_v16 }
  0x3d   : > { %671 = vmatprep.subr.msk.mxu0 %vm289_vm0, %v254_v17 }
  0x40   : > { %672 = vmatpush3.xpose.msk.msra.mxu0 %vm289_vm0, %v254_v17 }
  0x41   : > { %673 = vmatprep.subr.msk.mxu0 %vm289_vm0, %v253_v18 }
  0x44   : > { %674 = vmatpush3.xpose.msk.msra.mxu0 %vm289_vm0, %v253_v18 }
  0x45   : > { %675 = vmatprep.subr.msk.mxu0 %vm289_vm0, %v252_v19 }
  0x48   : > { %676 = vmatpush3.xpose.msk.msra.mxu0 %vm289_vm0, %v252_v19 }
  0x49   : > { %677 = vmatprep.subr.msk.mxu0 %vm289_vm0, %v251_v20 }
  0x4c   : > { %678 = vmatpush3.xpose.msk.msra.mxu0 %vm289_vm0, %v251_v20 }
  0x4d   : > { %679 = vmatprep.subr.msk.mxu0 %vm289_vm0, %v250_v21 }
  0x50   : > { %680 = vmatpush3.xpose.msk.msra.mxu0 %vm289_vm0, %v250_v21 }
  0x51   : > { %681 = vmatprep.subr.msk.mxu0 %vm289_vm0, %v249_v22 }
  0x54   : > { %682 = vmatpush3.xpose.msk.msra.mxu0 %vm289_vm0, %v249_v22 }
  0x57   : > { %684 = vmatmul.mubr.msk.f32.vlgmr.msra.gmra.mxu0 %vm289_vm0, %v246_v23 }
  0x58   : > { %686 = vmatprep.mubr.msk.f32.mxu0 %vm289_vm0, %v247_v24 }
  0x5b   : > { %687 = vmatmul.mubr.msk.f32.gmra.mxu0 %vm289_vm0, %v248_v25 }
  0x90   : > { %v287_v27 = vpop.permute.xlu0 %286 }
  0x91   : > { %v277_v28 = vpop.permute.xlu1 %276 }
  0x94   : > { %v282_v32 = vpop.permute.xlu0 %281 }
  0x95   : > { %v272_v34 = vpop.permute.xlu1 %271 }
  0x98   : > { %v444_v44 = vpop.permute.xlu0 %443 }
 0x117   : > { %v685_v29 = vpop.f32.mrf.mxu0 }
 0x118   : > { %v422_v36 = vadd.f32 %v685_v29, %v277_v28 }
 0x119   : > { %v416_v30 = vpop.f32.mrf.mxu0 }
 0x11a   : > { %v417_v39 = vadd.f32 %v416_v30, %v272_v34  ;;  %v436_v41 = vmax.f32 %v422_v36, 0.0 }
 0x11b   : > { %v688_v31 = vpop.f32.mrf.mxu0 }
 0x11c   : > { %v432_v33 = vadd.f32 %v688_v31, %v287_v27  ;;  %v435_v42 = vmax.f32 %v417_v39, 0.0 }
 0x11d   : > { %v426_v35 = vpop.f32.mrf.mxu0 }
 0x11e   : > { %v438_v37 = vmax.f32 %v432_v33, 0.0  ;;  %v427_v38 = vadd.f32 %v426_v35, %v282_v32 }
 0x120   : > { %v437_v40 = vmax.f32 %v427_v38, 0.0  ;;  %690 = vmatpush3.msra.mxu1 %v438_v37 }
 0x121   : > { %691 = vmatprep.subr.mxu1 %v807_v26 }
 0x122   : > { %692 = vmatpush3.msra.mxu1 %v437_v40 }
 0x123   : > { %693 = vmatprep.subr.mxu1 %v807_v26 }
 0x124   : > { %694 = vmatpush3.msra.mxu1 %v436_v41 }
 0x125   : > { %695 = vmatprep.subr.mxu1 %v807_v26 }
 0x126   : > { %696 = vmatpush3.msra.mxu1 %v435_v42 }
 0x127   : > { %698 = vmatmul.mubr.msk.f32.vlgmr.msra.gmra.mxu1 %vm446_vm2, %v439_v43 }
 0x1e7   : > { %v516_v45 = vpop.f32.mrf.mxu1 }
 0x1e8   : > { %v517_v46 = vadd.f32 %v516_v45, %v444_v44 }
 0x1e9   : > { %v699_v47 = vpop.f32.mrf.mxu1 }
 0x1ea   : > { %520 = vst [vmem:[%s230_s17] sm:$0xf] %v517_v46 }
 0x1eb   : > { %757 = shalt.err (!%p754_p3)
}
 0x1ec   : > { %s758_s10 = scalar_lea.hbm %s981_s6, 64  ;;  %s762_s13 = scalar_lea.hbm %s1021_s5, 128 }
 0x1ed   : > { %p759_p4 = scmp.ne.s32.totalorder %s981_s6, %s758_s10  ;;  %p763_p9 = scmp.lt.s32.totalorder %s981_s6, %s1021_s5 }
 0x1ee   : > { %p764_p10 = scmp.lt.s32.totalorder %s762_s13, %s758_s10 }
 0x1ef   : > { %p760_p7 = pnand %p759_p4, %p878_p5 }
 0x1f0   : > { %p765_p11 = por %p764_p10, %p763_p9 }
 0x1f1   : > { %p761_p8 = pneg %p760_p7 }
 0x1f3   : > { %p766_p12 = pnand %p765_p11, %p761_p8 }
 0x1f5   : > { %769 = shalt.err (!%p766_p12)
}
 0x1f6   : > { %700 = dma.vmem_to_hbm [thread:$0]  (%p878_p5), %s536_s23, 64, %s981_s6, %s522_s30  }
 0x1f7 PF: > { %p706_p13 = scmp.ge.s32.totalorder %s804_s21, 2  ;;  %s547_s16 = sand.u32 1, %s792_s18  }
 0x1f8   : > { %s548_s17 = scalar_lea.sflag [#allocation3], %s547_s16 }
 0x1f9   : > { %p703_p0 = pnand %p706_p13, %p882_p6 }
 0x1fb   : > { %p704_p1 = pneg %p703_p0 }
 0x1fd   : > { %787 = dma.done.wait (%p704_p1), %s548_s17, 64  }
 0x1fe   : > { %789 = vsyncadd (%p704_p1), %s548_s17, 4294967232  ;;  %p15_p2 = scmp.ge.s32.totalorder %s865_s24, 4   ;;  %s1024_s18 = smov %s796_s19 }
 0x1ff   : > { %s1025_s19 = smov %s800_s20  ;;  %s1026_s20 = smov %s876_s27 }
 0x200   : > { %s1027_s21 = smov %s865_s24  ;;  %17 = sbr.rel (!%p15_p2) target bundleno = 3 (0x3), region = 75 }
 0x205   :  { %553 = vsyncpa [#allocation3], 1 }
 0x206   :  { %555 = vsyncpa [#allocation3 + $0x1], 1 }

</bundles_post_ra>
